<compile_context>
chip_gen: v7x
topology: tpu7x:2x2x1
jax: 0.10.0
libtpu: 0.0.40
codegen_flags: <defaults>
</compile_context>

<pallas_src>
import functools

import jax
import jax.numpy as jnp
from jax.experimental import pallas as pl
from jax.experimental.pallas import tpu as pltpu


# ---------------------------------------------------------------------------
# Generation-aware VMEM budgeting.
# ---------------------------------------------------------------------------

def _physical_vmem_bytes():
    """Physical VMEM per TensorCore (v5e/v6e: 128 MiB, v7x: 64 MiB)."""
    try:
        info = pltpu.get_tpu_info()
        cap = getattr(info, "vmem_capacity_bytes", None)
        if cap:
            return int(cap)
    except Exception:
        pass
    return 64 * 1024 * 1024        # conservative fallback (v7x per-TC size)


def _vmem_budgets():
    cap = _physical_vmem_bytes()
    # Scoped-VMEM limit requested from Mosaic: most of physical, capped at
    # 100 MiB (v5e/v6e) and ~51 MiB on v7x; leave headroom for internal scratch.
    vmem_limit = min(int(cap * 0.8), 100 * 1024 * 1024)
    block_budget = vmem_limit - 4 * 1024 * 1024
    return vmem_limit, block_budget


def _is_v5e():
    try:
        kind = jax.devices()[0].device_kind.lower()
    except Exception:
        return False
    return ("v5 lite" in kind) or ("v5e" in kind) or ("v5litepod" in kind)


def _round_up(x, m):
    return ((x + m - 1) // m) * m


# ---------------------------------------------------------------------------
# Tile-height selection (accounts for pipeline buffers AND kernel temporaries).
# ---------------------------------------------------------------------------

def _choose_tile_h(He, We, Cin, Cout_pad, *, x_itemsize, out_itemsize,
                   w_itemsize, vmem_budget, n_batch, min_grid_steps=8):
    Wo = We // 2

    def vmem_needed(tH):
        tHo = tH // 2
        in_blk = tH * We * Cin * x_itemsize
        out_blk = tHo * Wo * Cout_pad * out_itemsize
        w_blk = Cin * Cout_pad * w_itemsize
        small = (4 * Cin + 2 * Cout_pad) * 4
        # Double-buffered pipeline buffers for every operand (conservatively
        # charge the constant-index weight/scale/shift/bias as 2x as well;
        # TODO(synk): single-buffer them with pl.Buffered(1) once verified).
        bufs = 2 * (in_blk + out_blk + w_blk + small)
        # In-kernel f32 temporaries: BN/ReLU tile, W-pooled, H-pooled,
        # matmul lhs cast, f32 matmul result.
        tmp = (tH * We * Cin * 4
               + tH * Wo * Cin * 4
               + tHo * Wo * Cin * 4
               + tHo * Wo * Cin * w_itemsize
               + tHo * Wo * Cout_pad * 4)
        return bufs + tmp

    # Legal tile heights: He itself (single block -> block dims equal the full
    # array dims), or an even tH with (tH//2)*Wo % 8 == 0 so the flattened
    # output block keeps a sublane-aligned extent.
    cands = {He} | set(range(16, He, 16))
    cands |= {t for t in range(2, He, 2) if ((t // 2) * Wo) % 8 == 0}
    cands = sorted(cands)

    fitting = [t for t in cands if vmem_needed(t) <= vmem_budget]
    if not fitting:
        # TODO(synk): fall back to W tiling if even the smallest H tile
        # overflows VMEM (enormous We*Cin); take the smallest tile for now.
        return cands[0]

    tH = fitting[-1]
    # Keep enough grid steps for megacore sharding (v7x: 2 TCs) + pipelining at
    # small batch, but never shrink the tile below 16 rows.
    if n_batch * pl.cdiv(He, tH) < min_grid_steps:
        alts = [t for t in fitting if t >= 16]
        if alts:
            tH = max(alts, key=lambda t: (min(n_batch * pl.cdiv(He, t),
                                              min_grid_steps), t))
    return tH


# ---------------------------------------------------------------------------
# Kernel.
# ---------------------------------------------------------------------------

def _transition_kernel(x_ref, scale_ref, shift_ref, w_ref, b_ref, o_ref):
    """One (sample, H-slab) grid step.

    x_ref:     (1, tH, Wo, 2*Cin)   NHWC slab with adjacent W pixel pairs
                                    folded into the lane axis (io dtype)
    scale_ref: (1, 2*Cin)           folded BN scale (tiled twice along lanes)
    shift_ref: (1, 2*Cin)           folded BN shift (tiled twice along lanes)
    w_ref:     (Cin, Cout_pad)      1x1 conv weight * 0.25 (pool norm folded)
    b_ref:     (1, Cout_pad)        conv bias
    o_ref:     (1, tHo*Wo, Cout_pad) spatially-flattened, lane-dense output
    """
    x = x_ref[0].astype(jnp.float32)                     # (tH, Wo, 2*Cin)

    # Folded BatchNorm + ReLU (VPU).
    y = jnp.maximum(x * scale_ref[0] + shift_ref[0], 0.0)

    tH, Wo, C2 = y.shape
    Cin = C2 // 2
    tHo = tH // 2

    # 2x2 sum pool BEFORE the 1x1 conv (linear ops commute; ReLU is earlier).
    #  * W pairs sit adjacent along the lane axis -> contiguous lane slices.
    #  * H pairs: leading-dim reshape (layout preserving) + add.
    # The 1/4 pool normalisation is pre-folded into w_ref.
    y = y[..., :Cin] + y[..., Cin:]                      # (tH, Wo, Cin)
    y = y.reshape(tHo, 2, Wo, Cin).sum(axis=1)           # (tHo, Wo, Cin)

    # 1x1 conv == matmul on the MXU with f32 accumulation.  The flatten merges
    # the leading dim into M (free when Wo % 8 == 0).
    # TODO(synk): a 3-D dot_general could avoid the repack when Wo % 8 != 0.
    z = jnp.dot(y.reshape(tHo * Wo, Cin).astype(w_ref.dtype), w_ref[...],
                preferred_element_type=jnp.float32)
    z = z + b_ref[...]
    o_ref[0] = z.astype(o_ref.dtype)


def _transition_pallas(x_folded, scale2, shift2, w_mat, bias, *, out_dtype,
                       tile_h=None):
    """x_folded: (N, He, Wo, 2*Cin) -> (N, Ho, Wo, Cout_pad)."""
    N, He, Wo, C2 = x_folded.shape
    Cin = C2 // 2
    We = 2 * Wo
    Cout_pad = w_mat.shape[1]
    Ho = He // 2

    vmem_limit, block_budget = _vmem_budgets()
    if tile_h is None:
        tile_h = _choose_tile_h(
            He, We, Cin, Cout_pad,
            x_itemsize=jnp.dtype(x_folded.dtype).itemsize,
            out_itemsize=jnp.dtype(out_dtype).itemsize,
            w_itemsize=jnp.dtype(w_mat.dtype).itemsize,
            vmem_budget=block_budget, n_batch=N)
    assert tile_h % 2 == 0
    assert tile_h == He or ((tile_h // 2) * Wo) % 8 == 0, \
        "tile_h must keep the flattened output block sublane-aligned"
    tHo = tile_h // 2
    n_h = pl.cdiv(He, tile_h)          # non-divisor tile heights are allowed

    out = pl.pallas_call(
        _transition_kernel,
        out_shape=jax.ShapeDtypeStruct((N, Ho * Wo, Cout_pad), out_dtype),
        grid_spec=pltpu.PrefetchScalarGridSpec(
            num_scalar_prefetch=0,
            grid=(N, n_h),
            in_specs=[
                pl.BlockSpec((1, tile_h, Wo, C2), lambda n, h: (n, h, 0, 0)),
                pl.BlockSpec((1, C2), lambda n, h: (0, 0)),
                pl.BlockSpec((1, C2), lambda n, h: (0, 0)),
                pl.BlockSpec((Cin, Cout_pad), lambda n, h: (0, 0)),
                pl.BlockSpec((1, Cout_pad), lambda n, h: (0, 0)),
            ],
            out_specs=pl.BlockSpec((1, tHo * Wo, Cout_pad),
                                   lambda n, h: (n, h, 0)),
        ),
        compiler_params=pltpu.CompilerParams(
            dimension_semantics=("parallel", "parallel"),
            vmem_limit_bytes=int(vmem_limit),
        ),
    )(x_folded,
      scale2.reshape(1, C2).astype(jnp.float32),
      shift2.reshape(1, C2).astype(jnp.float32),
      w_mat,
      bias.reshape(1, Cout_pad).astype(jnp.float32))
    # Free metadata reshape of a contiguous HBM array.
    return out.reshape(N, Ho, Wo, Cout_pad)


# ---------------------------------------------------------------------------
# Public entry points.
# ---------------------------------------------------------------------------

@functools.partial(jax.jit, static_argnames=("eps", "training",
                                              "use_bf16_matmul", "io_dtype",
                                              "tile_h"))
def transition_forward_nhwc(x_nhwc, gamma, beta, running_mean, running_var,
                            conv_w, conv_b, *, eps=1e-5, training=True,
                            use_bf16_matmul=None, io_dtype=None, tile_h=None):
    """Channels-last fast path (preferred): no HBM layout transposes.

    training=True  -> BN uses batch statistics (single fused pass over x).
    training=False -> BN uses running statistics.
    io_dtype=jnp.bfloat16 halves the HBM bytes that bound this kernel
    (opt-in; changes numerics).  use_bf16_matmul=None auto-enables bf16 MXU
    inputs on v5e for large channel counts (f32 accumulation either way).
    """
    N, H, W, Cin = x_nhwc.shape
    Cout = conv_w.shape[0]

    if io_dtype is None:
        io_dtype = jnp.bfloat16 if x_nhwc.dtype == jnp.bfloat16 else jnp.float32
    io_dtype = jnp.dtype(io_dtype)

    # ---- BatchNorm statistics: one fused sum/sum-of-squares pass over x. ----
    if training:
        cnt = N * H * W
        xf = x_nhwc.astype(jnp.float32)       # fused into the reductions
        mean = jnp.sum(xf, axis=(0, 1, 2)) / cnt
        msq = jnp.sum(xf * xf, axis=(0, 1, 2)) / cnt
        # Single-pass E[x^2]-E[x]^2 avoids a second full HBM read of x.
        # TODO(synk): use a shifted two-pass variance if inputs are far from
        # zero-mean (f32 cancellation); PyTorch uses the two-pass form.
        var = jnp.maximum(msq - mean * mean, 0.0)
    else:
        mean = running_mean.astype(jnp.float32)
        var = running_var.astype(jnp.float32)
    # TODO(synk): training-mode in-place updates of running_mean/running_var
    # (nn.BatchNorm2d side effects) are not reproduced here.

    scale = gamma.astype(jnp.float32) / jnp.sqrt(var + eps)       # (Cin,)
    shift = beta.astype(jnp.float32) - mean * scale               # (Cin,)

    # ---- 1x1 conv weight: matmul layout, pool norm folded, lane padding. ----
    w_mat = conv_w.reshape(Cout, Cin).T.astype(jnp.float32) * 0.25  # (Cin, Cout)
    bias = conv_b.astype(jnp.float32)
    # Lane-dense output: pad Cout only to the next multiple of 128 (padding
    # further would just add HBM writes while the op is mem-bound).
    Cout_pad = _round_up(Cout, 128)
    if Cout_pad != Cout:
        w_mat = jnp.pad(w_mat, ((0, 0), (0, Cout_pad - Cout)))
        bias = jnp.pad(bias, (0, Cout_pad - Cout))

    if use_bf16_matmul is None:
        use_bf16_matmul = _is_v5e() and (Cin * Cout >= 512 * 512)
    mm_dtype = jnp.bfloat16 if use_bf16_matmul else jnp.float32

    # ---- AvgPool2d(2,2) floors odd spatial dims (crop last row/col). ----
    He, We = (H // 2) * 2, (W // 2) * 2
    assert He >= 2 and We >= 2, "spatial dims too small for 2x2 pooling"
    Wo = We // 2
    x_in = x_nhwc if (He, We) == (H, W) else x_nhwc[:, :He, :We, :]
    x_in = x_in.astype(io_dtype)
    # Fold adjacent W pixel pairs into the lane axis (contiguous HBM reshape,
    # free): (N, He, We, Cin) -> (N, He, Wo, 2*Cin).
    x_in = x_in.reshape(N, He, Wo, 2 * Cin)
    scale2 = jnp.tile(scale, 2)                                   # (2*Cin,)
    shift2 = jnp.tile(shift, 2)

    out = _transition_pallas(x_in, scale2, shift2, w_mat.astype(mm_dtype),
                             bias, out_dtype=io_dtype, tile_h=tile_h)
    if Cout_pad != Cout:            # conditional: no extra copy when Cout is
        out = out[..., :Cout]       # already a multiple of 128
    return out


@functools.partial(jax.jit, static_argnames=("eps", "training",
                                              "use_bf16_matmul", "io_dtype",
                                              "tile_h"))
def transition_forward(x_nchw, gamma, beta, running_mean, running_var,
                       conv_w, conv_b, *, eps=1e-5, training=True,
                       use_bf16_matmul=None, io_dtype=None, tile_h=None):
    """PyTorch-compatible NCHW interface, matching Transition.forward(x).

    NOTE: this op is HBM-bandwidth bound; the two layout transposes below
    (NCHW->NHWC of x, NHWC->NCHW of the output) cost more HBM traffic than the
    kernel itself.  If the surrounding model can stay channels-last, call
    transition_forward_nhwc directly and skip both.
    """
    x_nhwc = jnp.transpose(x_nchw, (0, 2, 3, 1))
    out_nhwc = transition_forward_nhwc(
        x_nhwc, gamma, beta, running_mean, running_var, conv_w, conv_b,
        eps=eps, training=training, use_bf16_matmul=use_bf16_matmul,
        io_dtype=io_dtype, tile_h=tile_h)
    return jnp.transpose(out_nhwc, (0, 3, 1, 2))


# ---------------------------------------------------------------------------
# Pure-JAX reference replicating the PyTorch forward (NCHW).
# ---------------------------------------------------------------------------

def _reference_forward(x_nchw, gamma, beta, running_mean, running_var,
                       conv_w, conv_b, *, eps=1e-5, training=True):
    x = x_nchw.astype(jnp.float32)
    if training:
        mean = jnp.mean(x, axis=(0, 2, 3))
        var = jnp.mean((x - mean[None, :, None, None]) ** 2, axis=(0, 2, 3))
    else:
        mean, var = running_mean, running_var
    xn = (x - mean[None, :, None, None]) / jnp.sqrt(var[None, :, None, None] + eps)
    xn = xn * gamma[None, :, None, None] + beta[None, :, None, None]
    xn = jnp.maximum(xn, 0.0)
    y = jnp.einsum("nchw,oc->nohw", xn,
                   conv_w.reshape(conv_w.shape[0], conv_w.shape[1]))
    y = y + conv_b[None, :, None, None]
    N, Co, H, W = y.shape
    He, We = (H // 2) * 2, (W // 2) * 2
    y = y[:, :, :He, :We]
    y = y.reshape(N, Co, He // 2, 2, We // 2, 2).mean(axis=(3, 5))
    return y


if __name__ == "__main__":
    key = jax.random.PRNGKey(0)
    k_x, k_g, k_b, k_rm, k_rv, k_w, k_cb, k_x2 = jax.random.split(key, 8)

    N, Cin, H, W = 2, 4, 16, 16
    Cout = 8

    x = jax.random.normal(k_x, (N, Cin, H, W), dtype=jnp.float32)
    gamma = jax.random.normal(k_g, (Cin,), dtype=jnp.float32) * 0.1 + 1.0
    beta = jax.random.normal(k_b, (Cin,), dtype=jnp.float32) * 0.1
    running_mean = jax.random.normal(k_rm, (Cin,), dtype=jnp.float32) * 0.1
    running_var = jnp.abs(jax.random.normal(k_rv, (Cin,), dtype=jnp.float32)) * 0.1 + 1.0
    conv_w = jax.random.normal(k_w, (Cout, Cin, 1, 1), dtype=jnp.float32) * 0.2
    conv_b = jax.random.normal(k_cb, (Cout,), dtype=jnp.float32) * 0.1

    args = (gamma, beta, running_mean, running_var, conv_w, conv_b)
    ref = _reference_forward(x, *args, training=True)

    # 1) NCHW PyTorch-compatible path, training mode (batch statistics).
    out = jax.block_until_ready(transition_forward(x, *args, training=True))
    assert out.shape == (N, Cout, H // 2, W // 2), out.shape
    assert jnp.allclose(out, ref, atol=1e-4, rtol=1e-4), \
        float(jnp.max(jnp.abs(out - ref)))

    # 2) Eval mode (running statistics).
    out_e = jax.block_until_ready(transition_forward(x, *args, training=False))
    ref_e = _reference_forward(x, *args, training=False)
    assert jnp.allclose(out_e, ref_e, atol=1e-5, rtol=1e-5), \
        float(jnp.max(jnp.abs(out_e - ref_e)))

    # 3) Channels-last fast path (no HBM transposes).
    x_nhwc = jnp.transpose(x, (0, 2, 3, 1))
    out_nhwc = jax.block_until_ready(
        transition_forward_nhwc(x_nhwc, *args, training=True))
    assert jnp.allclose(jnp.transpose(out_nhwc, (0, 3, 1, 2)), ref,
                        atol=1e-4, rtol=1e-4)

    # 4) Odd spatial sizes (PyTorch AvgPool2d floors: last row/col dropped).
    x_odd = jax.random.normal(k_x2, (N, Cin, 15, 17), dtype=jnp.float32)
    out_o = jax.block_until_ready(transition_forward(x_odd, *args, training=True))
    ref_o = _reference_forward(x_odd, *args, training=True)
    assert out_o.shape == (N, Cout, 7, 8), out_o.shape
    assert jnp.allclose(out_o, ref_o, atol=1e-4, rtol=1e-4), \
        float(jnp.max(jnp.abs(out_o - ref_o)))

    # 5) Multi-block H grid (tile_h=4) and non-divisor tile / partial blocks
    #    (tile_h=6, cdiv grid).
    out_t4 = jax.block_until_ready(
        transition_forward(x, *args, training=True, tile_h=4))
    assert jnp.allclose(out_t4, ref, atol=1e-4, rtol=1e-4)
    out_t6 = jax.block_until_ready(
        transition_forward(x, *args, training=True, tile_h=6))
    assert jnp.allclose(out_t6, ref, atol=1e-4, rtol=1e-4)

    # 6) bf16 I/O + bf16 matmul smoke test (opt-in reduced precision).
    out_bf = jax.block_until_ready(
        transition_forward(x, *args, training=True,
                           io_dtype=jnp.bfloat16, use_bf16_matmul=True))
    assert jnp.allclose(out_bf.astype(jnp.float32), ref, atol=5e-2, rtol=5e-2), \
        float(jnp.max(jnp.abs(out_bf.astype(jnp.float32) - ref)))

    print("KERNEL_OK")
</pallas_src>

<mosaic_0001>
module attributes {stable_mosaic.version = 11 : i64} {
  func.func @_transition_kernel(%arg0: i32, %arg1: i32, %arg2: memref<1x16x8x8xf32, #tpu.memory_space<vmem>>, %arg3: memref<1x8xf32, #tpu.memory_space<vmem>>, %arg4: memref<1x8xf32, #tpu.memory_space<vmem>>, %arg5: memref<4x128xf32, #tpu.memory_space<vmem>>, %arg6: memref<1x128xf32, #tpu.memory_space<vmem>>, %arg7: memref<1x64x128xf32, #tpu.memory_space<vmem>>) attributes {dimension_semantics = [#tpu.dimension_semantics<parallel>, #tpu.dimension_semantics<parallel>], iteration_bounds = array<i64: 2, 1>, scalar_prefetch = 0 : i64, scratch_operands = 0 : i64, tpu.core_type = #tpu.core_type<tc>, window_params = [{transform_indices = @transform_0, window_bounds = array<i64: 1, 16, 8, 8>}, {pipeline_mode = #tpu.pipeline_mode<synchronous>, transform_indices = @transform_1, window_bounds = array<i64: 1, 8>}, {pipeline_mode = #tpu.pipeline_mode<synchronous>, transform_indices = @transform_2, window_bounds = array<i64: 1, 8>}, {pipeline_mode = #tpu.pipeline_mode<synchronous>, transform_indices = @transform_3, window_bounds = array<i64: 4, 128>}, {pipeline_mode = #tpu.pipeline_mode<synchronous>, transform_indices = @transform_4, window_bounds = array<i64: 1, 128>}, {transform_indices = @transform_5, window_bounds = array<i64: 1, 64, 128>}]} {
    %c0 = arith.constant 0 : index
    %c0_0 = arith.constant 0 : index
    %c0_1 = arith.constant 0 : index
    %c0_2 = arith.constant 0 : index
    %0 = vector.load %arg2[%c0, %c0_0, %c0_1, %c0_2] : memref<1x16x8x8xf32, #tpu.memory_space<vmem>>, vector<1x16x8x8xf32>
    %1 = vector.shape_cast %0 : vector<1x16x8x8xf32> to vector<16x8x8xf32>
    %c0_3 = arith.constant 0 : index
    %c0_4 = arith.constant 0 : index
    %2 = vector.load %arg3[%c0_3, %c0_4] : memref<1x8xf32, #tpu.memory_space<vmem>>, vector<1x8xf32>
    %3 = vector.shape_cast %2 : vector<1x8xf32> to vector<8xf32>
    %4 = vector.shape_cast %3 : vector<8xf32> to vector<1x1x8xf32>
    %5 = vector.broadcast %4 : vector<1x1x8xf32> to vector<16x8x8xf32>
    %6 = arith.mulf %1, %5 : vector<16x8x8xf32>
    %c0_5 = arith.constant 0 : index
    %c0_6 = arith.constant 0 : index
    %7 = vector.load %arg4[%c0_5, %c0_6] : memref<1x8xf32, #tpu.memory_space<vmem>>, vector<1x8xf32>
    %8 = vector.shape_cast %7 : vector<1x8xf32> to vector<8xf32>
    %9 = vector.shape_cast %8 : vector<8xf32> to vector<1x1x8xf32>
    %10 = vector.broadcast %9 : vector<1x1x8xf32> to vector<16x8x8xf32>
    %11 = arith.addf %6, %10 : vector<16x8x8xf32>
    %cst = arith.constant 0.000000e+00 : f32
    %12 = vector.broadcast %cst : f32 to vector<16x8x8xf32>
    %13 = arith.maximumf %11, %12 : vector<16x8x8xf32>
    %14 = vector.extract_strided_slice %13 {offsets = [0, 0, 0], sizes = [16, 8, 4], strides = [1, 1, 1]} : vector<16x8x8xf32> to vector<16x8x4xf32>
    %15 = vector.extract_strided_slice %13 {offsets = [0, 0, 4], sizes = [16, 8, 4], strides = [1, 1, 1]} : vector<16x8x8xf32> to vector<16x8x4xf32>
    %16 = arith.addf %14, %15 : vector<16x8x4xf32>
    %17 = vector.shape_cast %16 : vector<16x8x4xf32> to vector<8x2x8x4xf32>
    %cst_7 = arith.constant dense<0.000000e+00> : vector<8x8x4xf32>
    %18 = vector.multi_reduction <add>, %17, %cst_7 [1] : vector<8x2x8x4xf32> to vector<8x8x4xf32>
    %19 = vector.shape_cast %18 : vector<8x8x4xf32> to vector<64x4xf32>
    %c0_8 = arith.constant 0 : index
    %c0_9 = arith.constant 0 : index
    %20 = vector.load %arg5[%c0_8, %c0_9] : memref<4x128xf32, #tpu.memory_space<vmem>>, vector<4x128xf32>
    %cst_10 = arith.constant dense<0.000000e+00> : vector<64x128xf32>
    %21 = tpu.matmul %19, %20, %cst_10 {dimension_numbers = #tpu.dot_dimension_numbers<[1], [0], [0], [1], [0, 0, 1, 1], [], []>} : vector<64x4xf32>, vector<4x128xf32>, vector<64x128xf32> -> vector<64x128xf32>
    %c0_11 = arith.constant 0 : index
    %c0_12 = arith.constant 0 : index
    %22 = vector.load %arg6[%c0_11, %c0_12] : memref<1x128xf32, #tpu.memory_space<vmem>>, vector<1x128xf32>
    %23 = vector.broadcast %22 : vector<1x128xf32> to vector<64x128xf32>
    %24 = arith.addf %21, %23 : vector<64x128xf32>
    %c0_13 = arith.constant 0 : index
    %c0_14 = arith.constant 0 : index
    %c0_15 = arith.constant 0 : index
    %25 = vector.load %arg7[%c0_13, %c0_14, %c0_15] : memref<1x64x128xf32, #tpu.memory_space<vmem>>, vector<1x64x128xf32>
    %26 = vector.shape_cast %25 : vector<1x64x128xf32> to vector<64x128xf32>
    %27 = vector.shape_cast %24 : vector<64x128xf32> to vector<1x64x128xf32>
    tpu.vector_store %arg7[%c0_13, %c0_14, %c0_15], %27 {strides = array<i32>} : memref<1x64x128xf32, #tpu.memory_space<vmem>>, vector<1x64x128xf32>,
    return
  }
  func.func @transform_0(%arg0: i32, %arg1: i32) -> (i32, i32, i32, i32) {
    %c0_i32 = arith.constant 0 : i32
    %c0_i32_0 = arith.constant 0 : i32
    %c0_i32_1 = arith.constant 0 : i32
    return %arg0, %arg1, %c0_i32, %c0_i32_0 : i32, i32, i32, i32
  }
  func.func @transform_1(%arg0: i32, %arg1: i32) -> (i32, i32) {
    %c0_i32 = arith.constant 0 : i32
    %c0_i32_0 = arith.constant 0 : i32
    %c0_i32_1 = arith.constant 0 : i32
    return %c0_i32, %c0_i32_0 : i32, i32
  }
  func.func @transform_2(%arg0: i32, %arg1: i32) -> (i32, i32) {
    %c0_i32 = arith.constant 0 : i32
    %c0_i32_0 = arith.constant 0 : i32
    %c0_i32_1 = arith.constant 0 : i32
    return %c0_i32, %c0_i32_0 : i32, i32
  }
  func.func @transform_3(%arg0: i32, %arg1: i32) -> (i32, i32) {
    %c0_i32 = arith.constant 0 : i32
    %c0_i32_0 = arith.constant 0 : i32
    %c0_i32_1 = arith.constant 0 : i32
    return %c0_i32, %c0_i32_0 : i32, i32
  }
  func.func @transform_4(%arg0: i32, %arg1: i32) -> (i32, i32) {
    %c0_i32 = arith.constant 0 : i32
    %c0_i32_0 = arith.constant 0 : i32
    %c0_i32_1 = arith.constant 0 : i32
    return %c0_i32, %c0_i32_0 : i32, i32
  }
  func.func @transform_5(%arg0: i32, %arg1: i32) -> (i32, i32, i32) {
    %c0_i32 = arith.constant 0 : i32
    %c0_i32_0 = arith.constant 0 : i32
    return %arg0, %arg1, %c0_i32 : i32, i32, i32
  }
}

</mosaic_0001>

<bundles_post_ra>
// kernel: tile.17
= control target key start
LH: loop header
LB: loop body
LE: loop exit
PB: predicated region body
PF: predicated region fallthrough
CT: control target
= control target key end

     0   :  { %s22_s0 = inlined_call_operand.vmem [shape: f32[4], index: 0, kind: input, shape index: {}]   ;;  %s23_s1 = inlined_call_operand.vmem [shape: f32[2,4], index: 1, kind: output, shape index: {}]  }
   0x1   :  { %v4_v0 = vld [vmem:[%s22_s0] ss:$0 sm:$0xff] }
   0x2   :  { %5 = vst [vmem:[%s23_s1] sm:$0x3] %v4_v0 }

// kernel: tile.19
= control target key start
LH: loop header
LB: loop body
LE: loop exit
PB: predicated region body
PF: predicated region fallthrough
CT: control target
= control target key end

     0   :  { %vm7_vm0 = vcmask 31744   ;;  %vm13_vm1 = vcmask 64544   ;;  %s39_s0 = inlined_call_operand.vmem [shape: f32[2,4], index: 0, kind: input, shape index: {}]   ;;  %s40_s1 = inlined_call_operand.vmem [shape: f32[1,8], index: 1, kind: output, shape index: {}]  }
   0x1   :  { %v4_v0 = vld [vmem:[%s39_s0] sm:$0x3]  ;;  %s22_s0 = smov 4  }
   0x2   :  { %5 = vst [vmem:[#allocation1] sm:$0x3] %v4_v0 }
   0x9   :  { %v10_v1 = vld [vmem:[#allocation1 + $0x1] sm:$0x1]   ;;  %v6_v2 = vld [vmem:[#allocation1] sm:$0x1]  }
   0xa   :  { %11 = vrot.lane.b32.xlu0 %v10_v1, %s22_s0  ;;  %8 = vst.msk [vmem:[#allocation0] sm:$0x1] %vm7_vm0, %v6_v2  }
  0x7c   :  { %v12_v3 = vpop.permute.xlu0 %11  }
  0x7d   :  { %14 = vst.msk [vmem:[#allocation0] sm:$0x1] %vm13_vm1, %v12_v3  }
  0x84   :  { %v18_v4 = vld [vmem:[#allocation0] sm:$0x1] }
  0x85   :  { %20 = vst [vmem:[%s40_s1] sm:$0x1] %v18_v4 }

// kernel: transition_forward_nhwc.1
= control target key start
LH: loop header
LB: loop body
LE: loop exit
PB: predicated region body
PF: predicated region fallthrough
CT: control target
= control target key end

     0   :  { %10 = vsyncpa [#allocation3], 0  ;;  %s1210_s0 = inlined_call_operand.vmem [shape: f32[2,16,8,8], index: 0, kind: input, shape index: {}]   ;;  %s1211_s1 = inlined_call_operand.vmem [shape: f32[1,8], index: 1, kind: input, shape index: {}]   ;;  %s1212_s2 = inlined_call_operand.vmem [shape: f32[1,8], index: 2, kind: input, shape index: {}]   ;;  %s1213_s3 = inlined_call_operand.vmem [shape: f32[4,128], index: 3, kind: input, shape index: {}]   ;;  %s1214_s4 = inlined_call_operand.vmem [shape: f32[1,128], index: 4, kind: input, shape index: {}]   ;;  %s1215_s5 = inlined_call_operand.hbm [shape: f32[2,64,128], index: 5, kind: output, shape index: {}]  }
   0x1   :  { %12 = vsyncpa [#allocation3 + $0x1], 0  ;;  %s905_s18 = smov 0   ;;  %s907_s19 = smov 0  }
   0x2   :  { %s909_s20 = smov 0   ;;  %s911_s21 = smov 0  }
   0x3   :  { %s913_s22 = smov 0   ;;  %s915_s23 = smov 0  }
   0x4 LB: > { %s681_s24 = sadd.s32 4294967295, %s869_s23   ;;  %s682_s25 = sadd.s32 4294967294, %s869_s23   ;;  %s869_s23 = sphi %s915_s23, %s18_s23   ;;  %s865_s22 = sphi %s913_s22, %s1222_s22   ;;  %s861_s21 = sphi %s911_s21, %s1221_s21   ;;  %s857_s20 = sphi %s909_s20, %s1220_s20   ;;  %s853_s19 = sphi %s907_s19, %s1219_s19   ;;  %s849_s18 = sphi %s905_s18, %s1218_s18  }
   0x5   : > { %s30_s26 = sadd.s32 1, %s865_s22  ;;  %s151_s27 = sadd.s32 1, %s857_s20 }
   0x6   : > { %p32_p0 = scmp.ge.s32.totalorder %s30_s26, 2  ;;  %p161_p1 = scmp.ne.s32.totalorder %s857_s20, %s853_s19 }
   0x7   : > { %p162_p2 = scmp.eq.s32.totalorder %s681_s24, 1  ;;  %p167_p3 = scmp.ne.s32.totalorder %s853_s19, %s849_s18 }
   0x8   : > { %s1224_s26 = smov (%p32_p0, %s30_s26), 0  ;;  %p168_p5 = scmp.eq.s32.totalorder %s682_s25, 1 }
   0x9   : > { %p945_p4 = por %p162_p2, %p161_p1  ;;  %s146_s29 = ssub.s32 %s865_s22, %s1224_s26 }
   0xa   : > { %p685_p6 = scmp.ge.s32.totalorder %s869_s23, 1  ;;  %p149_p7 = scmp.eq.s32.totalorder %s146_s29, 0 }
   0xb   : > { %p952_p8 = por %p168_p5, %p167_p3  ;;  %p211_p9 = scmp.lt.s32.totalorder %s869_s23, 3 }
   0xc   : > { %s958_s6 = scalar_select %p149_p7, %s857_s20, %s151_s27  }
   0xd   : > { %p212_p10 = pnand %p685_p6, %p211_p9 }
   0xe   : > { %p244_p11 = scmp.lt.s32.totalorder (!%p212_p10), %s861_s21, 1  ;;  %v965_v0 = vld [vmem:[%s1211_s1] ss:$0 sm:$0xff] (!%p212_p10)  ;;  %s871_s16 = smov (!%p212_p10), 124   ;;  %vm469_vm0 = vcmask (!%p212_p10), 1043456   ;;  %vm412_vm1 = vcmask (!%p212_p10), 31744  }
   0xf   : > { %215 = sbr.rel (%p212_p10) target bundleno = 412 (0x19c), region = 40  ;;  %v975_v1 = vld [vmem:[%s1212_s2] ss:$0 sm:$0xff] (!%p212_p10)  ;;  %s240_s25 = sand.u32 (!%p212_p10), 1, %s853_s19  }
  0x10   : > { %v437_v37 = vld [vmem:[%s1213_s3] sm:$0xf] (!%p212_p10)  ;;  %s686_s27 = sshll.u32 (!%p212_p10), %s240_s25, 6  ;;  %s707_s9 = sshll.u32 (!%p212_p10), %s861_s21, 10 }
  0x11   : > { %717 = vmatprep.subr.msk.mxu0 (!%p212_p10), %vm469_vm0, %v437_v37  ;;  %731 = vmatprep.subr.msk.mxu1 (!%p212_p10), %vm469_vm0, %v437_v37  ;;  %s872_s15 = smov (!%p212_p10), [#allocation2]  }
  0x12   : > { %718 = vmatpush3.msk.msra.mxu0 (!%p212_p10), %vm469_vm0, %v437_v37  ;;  %732 = vmatpush3.msk.msra.mxu1 (!%p212_p10), %vm469_vm0, %v437_v37 }
  0x16   : > { %s245_s7 = scalar_select %p244_p11, %s861_s21, 1 }
  0x17   : > { %s1164_s21 = scalar_lea.sflag [#allocation3], %s240_s25 }
  0x18   : > { %s706_s8 = sshll.u32 %s245_s7, 7 }
  0x19   : > { %s970_s13 = scalar_lea.vmem %s1210_s0, %s706_s8  ;;  %s242_s8 = scalar_lea.vmem [#allocation2], %s686_s27 }
  0x1a   : > { %v262_v2 = vld [vmem:[%s970_s13 + $0x40] sm:$0xff]  ;;  %v263_v4 = vld [vmem:[%s970_s13 + $0x48] sm:$0xff]  ;;  %v257_v9 = vld [vmem:[%s970_s13 + $0x18] sm:$0xff]  ;;  %s602_s10 = sshll.u32 %s242_s8, 4  ;;  %s1160_s10 = int_to_ptr.vmem [resolvable:$true] %s602_s10 }
  0x1b   : > { %v254_v3 = vld [vmem:[%s970_s13] sm:$0xff]  ;;  %v285_v5 = vmul.f32 %v965_v0, %v262_v2  ;;  %v286_v7 = vmul.f32 %v965_v0, %v263_v4  ;;  %v255_v8 = vld [vmem:[%s970_s13 + $0x8] sm:$0xff]  ;;  %v256_v10 = vld [vmem:[%s970_s13 + $0x10] sm:$0xff]  ;;  %v280_v12 = vmul.f32 %v965_v0, %v257_v9  ;;  %s791_s14 = scalar_lea.vmem %s1160_s10, 1024 }
  0x1c   : > { %v277_v6 = vmul.f32 %v965_v0, %v254_v3  ;;  %v278_v11 = vmul.f32 %v965_v0, %v255_v8  ;;  %v279_v16 = vmul.f32 %v965_v0, %v256_v10  ;;  %v265_v17 = vld [vmem:[%s970_s13 + $0x58] sm:$0xff]  ;;  %v264_v19 = vld [vmem:[%s970_s13 + $0x50] sm:$0xff]  ;;  %v259_v28 = vld [vmem:[%s970_s13 + $0x28] sm:$0xff]  ;;  %p792_p12 = scmp.ne.s32.totalorder %s1160_s10, %s791_s14 }
  0x1d   : > { %v989_v13 = vadd.f32 %v975_v1, %v285_v5  ;;  %v995_v15 = vadd.f32 %v975_v1, %v286_v7  ;;  %v1006_v22 = vadd.f32 %v975_v1, %v280_v12  ;;  %v288_v23 = vmul.f32 %v965_v0, %v265_v17  ;;  %v258_v29 = vld [vmem:[%s970_s13 + $0x20] sm:$0xff]  ;;  %v267_v36 = vld [vmem:[%s970_s13 + $0x68] sm:$0xff]  ;;  %v261_v45 = vld [vmem:[%s970_s13 + $0x38] sm:$0xff] }
  0x1e   : > { %v992_v14 = vadd.f32 %v975_v1, %v277_v6  ;;  %v1000_v18 = vadd.f32 %v975_v1, %v278_v11  ;;  %v1018_v26 = vadd.f32 %v975_v1, %v279_v16  ;;  %v287_v27 = vmul.f32 %v965_v0, %v264_v19  ;;  %v266_v38 = vld [vmem:[%s970_s13 + $0x60] sm:$0xff]  ;;  %v260_v46 = vld [vmem:[%s970_s13 + $0x30] sm:$0xff]  ;;  %v269_v53 = vld [vmem:[%s970_s13 + $0x78] sm:$0xff]  ;;  %p793_p13 = pnand %p792_p12, %p945_p4 }
  0x1f   : > { %v324_v20 = vmax.f32 %v989_v13, 0.0  ;;  %v325_v24 = vmax.f32 %v995_v15, 0.0  ;;  %v319_v30 = vmax.f32 %v1006_v22, 0.0  ;;  %v1025_v31 = vadd.f32 %v975_v1, %v288_v23  ;;  %v268_v54 = vld [vmem:[%s970_s13 + $0x70] sm:$0xff]  ;;  %s1158_s13 = scalar_lea.hbm %s1215_s5, %s707_s9 }
  0x20   : > { %v316_v21 = vmax.f32 %v992_v14, 0.0  ;;  %v317_v25 = vmax.f32 %v1000_v18, 0.0  ;;  %v318_v32 = vmax.f32 %v1018_v26, 0.0  ;;  %v1035_v33 = vadd.f32 %v975_v1, %v287_v27  ;;  %p794_p0 = pneg %p793_p13 }
  0x21   : > { %364 = vrot.lane.b32.xlu1 %v324_v20, %s871_s16  ;;  %v282_v34 = vmul.f32 %v965_v0, %v259_v28  ;;  %v281_v35 = vmul.f32 %v965_v0, %v258_v29  ;;  %v327_v39 = vmax.f32 %v1025_v31, 0.0  ;;  %v290_v40 = vmul.f32 %v965_v0, %v267_v36 }
  0x22   : > { %348 = vrot.lane.b32.xlu0 %v316_v21, %s871_s16  ;;  %v326_v41 = vmax.f32 %v1035_v33, 0.0  ;;  %v289_v44 = vmul.f32 %v965_v0, %v266_v38  ;;  %v284_v47 = vmul.f32 %v965_v0, %v261_v45  ;;  %v283_v48 = vmul.f32 %v965_v0, %v260_v46 }
  0x23   : > { %v1054_v42 = vadd.f32 %v975_v1, %v282_v34  ;;  %v1057_v43 = vadd.f32 %v975_v1, %v281_v35  ;;  %v1073_v51 = vadd.f32 %v975_v1, %v290_v40  ;;  %v292_v56 = vmul.f32 %v965_v0, %v269_v53 }
  0x24   : > { %v1076_v52 = vadd.f32 %v975_v1, %v289_v44  ;;  %v1081_v55 = vadd.f32 %v975_v1, %v284_v47  ;;  %v1089_v59 = vadd.f32 %v975_v1, %v283_v48  ;;  %v291_v60 = vmul.f32 %v965_v0, %v268_v54 }
  0x25   : > { %366 = vrot.lane.b32.xlu1 %v325_v24, %s871_s16  ;;  %v321_v49 = vmax.f32 %v1054_v42, 0.0  ;;  %v320_v50 = vmax.f32 %v1057_v43, 0.0  ;;  %v329_v57 = vmax.f32 %v1073_v51, 0.0  ;;  %v1097_v63 = vadd.f32 %v975_v1, %v292_v56 }
  0x26   : > { %350 = vrot.lane.b32.xlu0 %v317_v25, %s871_s16  ;;  %v328_v58 = vmax.f32 %v1076_v52, 0.0  ;;  %v323_v61 = vmax.f32 %v1081_v55, 0.0  ;;  %v322_v62 = vmax.f32 %v1089_v59, 0.0  ;;  %v1100_v2 = vadd.f32 %v975_v1, %v291_v60  ;;  %v691_v59 = vld [vmem:[%s1214_s4] ss:$0 sm:$0xff] }
  0x27   : > { %v331_v0 = vmax.f32 %v1097_v63, 0.0 }
  0x28   : > { %v330_v3 = vmax.f32 %v1100_v2, 0.0 }
  0x29   : > { %354 = vrot.lane.b32.xlu1 %v319_v30, %s871_s16 }
  0x2a   : > { %352 = vrot.lane.b32.xlu0 %v318_v32, %s871_s16 }
  0x2d   : > { %370 = vrot.lane.b32.xlu1 %v327_v39, %s871_s16 }
  0x2e   : > { %368 = vrot.lane.b32.xlu0 %v326_v41, %s871_s16 }
  0x31   : > { %358 = vrot.lane.b32.xlu1 %v321_v49, %s871_s16 }
  0x32   : > { %356 = vrot.lane.b32.xlu0 %v320_v50, %s871_s16 }
  0x35   : > { %374 = vrot.lane.b32.xlu1 %v329_v57, %s871_s16 }
  0x36   : > { %372 = vrot.lane.b32.xlu0 %v328_v58, %s871_s16 }
  0x39   : > { %362 = vrot.lane.b32.xlu1 %v323_v61, %s871_s16 }
  0x3a   : > { %360 = vrot.lane.b32.xlu0 %v322_v62, %s871_s16 }
  0x3d   : > { %378 = vrot.lane.b32.xlu1 %v331_v0, %s871_s16 }
  0x3e   : > { %376 = vrot.lane.b32.xlu0 %v330_v3, %s871_s16  ;;  %s795_s16 = sshll.u32 %s872_s15, 4  ;;  %s796_s16 = int_to_ptr.vmem [resolvable:$false] %s795_s16 }
  0x3f   : > { %s797_s17 = scalar_lea.vmem %s796_s16, 2048  ;;  %p798_p1 = scmp.lt.s32.totalorder %s1160_s10, %s796_s16 }
  0x40   : > { %p799_p2 = scmp.lt.s32.totalorder %s797_s17, %s791_s14 }
  0x42   : > { %p800_p3 = por %p799_p2, %p798_p1 }
  0x44   : > { %p801_p5 = pnand %p800_p3, %p794_p0 }
  0x93   : > { %v365_v4 = vpop.permute.xlu1 %364 }
  0x94   : > { %v349_v5 = vpop.permute.xlu0 %348  ;;  %v404_v6 = vadd.f32 %v365_v4, %v324_v20 }
  0x95   : > { %v396_v1 = vadd.f32 %v349_v5, %v316_v21 }
  0x96   : > { %v425_v16 = vsel %vm412_vm1, %v404_v6, 0.0 }
  0x97   : > { %v367_v7 = vpop.permute.xlu1 %366  ;;  %v413_v11 = vsel %vm412_vm1, %v396_v1, 0.0 }
  0x98   : > { %v351_v8 = vpop.permute.xlu0 %350  ;;  %v405_v9 = vadd.f32 %v367_v7, %v325_v24 }
  0x99   : > { %v397_v10 = vadd.f32 %v351_v8, %v317_v25 }
  0x9a   : > { %v426_v13 = vsel %vm412_vm1, %v405_v9, 0.0 }
  0x9b   : > { %v414_v12 = vsel %vm412_vm1, %v397_v10, 0.0  ;;  %v355_v17 = vpop.permute.xlu1 %354  ;;  %v427_v20 = vadd.f32 %v426_v13, %v425_v16 }
  0x9c   : > { %v353_v14 = vpop.permute.xlu0 %352  ;;  %v415_v19 = vadd.f32 %v414_v12, %v413_v11  ;;  %v399_v21 = vadd.f32 %v355_v17, %v319_v30 }
  0x9d   : > { %v398_v15 = vadd.f32 %v353_v14, %v318_v32  ;;  %725 = vmatprep.mubr.msk.f32.mxu1 %vm412_vm1, %v427_v20 }
  0x9e   : > { %719 = vmatprep.mubr.msk.f32.mxu0 %vm412_vm1, %v415_v19  ;;  %v417_v18 = vsel %vm412_vm1, %v399_v21, 0.0 }
  0x9f   : > { %v416_v23 = vsel %vm412_vm1, %v398_v15, 0.0  ;;  %v371_v25 = vpop.permute.xlu1 %370 }
  0xa0   : > { %v418_v24 = vadd.f32 %v417_v18, %v416_v23  ;;  %v369_v27 = vpop.permute.xlu0 %368  ;;  %v407_v28 = vadd.f32 %v371_v25, %v327_v39 }
  0xa1   : > { %v406_v22 = vadd.f32 %v369_v27, %v326_v41 }
  0xa2   : > { %720 = vmatmul.mubr.msk.f32.vlgmr.msra.gmra.mrb[0].mxu0 %vm412_vm1, %v418_v24  ;;  %v429_v26 = vsel %vm412_vm1, %v407_v28, 0.0 }
  0xa3   : > { %v428_v29 = vsel %vm412_vm1, %v406_v22, 0.0  ;;  %v359_v32 = vpop.permute.xlu1 %358 }
  0xa4   : > { %v430_v30 = vadd.f32 %v429_v26, %v428_v29  ;;  %v357_v34 = vpop.permute.xlu0 %356  ;;  %v401_v35 = vadd.f32 %v359_v32, %v321_v49 }
  0xa5   : > { %v400_v36 = vadd.f32 %v357_v34, %v320_v50 }
  0xa6   : > { %726 = vmatmul.mubr.msk.f32.vlgmr.msra.gmra.mrb[0].mxu1 %vm412_vm1, %v430_v30  ;;  %v420_v37 = vsel %vm412_vm1, %v401_v35, 0.0 }
  0xa7   : > { %v419_v31 = vsel %vm412_vm1, %v400_v36, 0.0  ;;  %v375_v33 = vpop.permute.xlu1 %374 }
  0xa8   : > { %v421_v38 = vadd.f32 %v420_v37, %v419_v31  ;;  %v373_v39 = vpop.permute.xlu0 %372  ;;  %v409_v40 = vadd.f32 %v375_v33, %v329_v57 }
  0xa9   : > { %v408_v41 = vadd.f32 %v373_v39, %v328_v58 }
  0xaa   : > { %722 = vmatprep.mubr.msk.f32.mxu0 %vm412_vm1, %v421_v38  ;;  %v432_v42 = vsel %vm412_vm1, %v409_v40, 0.0 }
  0xab   : > { %v431_v43 = vsel %vm412_vm1, %v408_v41, 0.0  ;;  %v363_v45 = vpop.permute.xlu1 %362 }
  0xac   : > { %v433_v44 = vadd.f32 %v432_v42, %v431_v43  ;;  %v361_v46 = vpop.permute.xlu0 %360  ;;  %v403_v47 = vadd.f32 %v363_v45, %v323_v61 }
  0xad   : > { %v402_v48 = vadd.f32 %v361_v46, %v322_v62 }
  0xae   : > { %728 = vmatprep.mubr.msk.f32.mxu1 %vm412_vm1, %v433_v44  ;;  %v423_v49 = vsel %vm412_vm1, %v403_v47, 0.0 }
  0xaf   : > { %v422_v50 = vsel %vm412_vm1, %v402_v48, 0.0  ;;  %v379_v52 = vpop.permute.xlu1 %378 }
  0xb0   : > { %v424_v51 = vadd.f32 %v423_v49, %v422_v50  ;;  %v377_v53 = vpop.permute.xlu0 %376  ;;  %v411_v54 = vadd.f32 %v379_v52, %v331_v0 }
  0xb1   : > { %v410_v55 = vadd.f32 %v377_v53, %v330_v3 }
  0xb2   : > { %723 = vmatmul.mubr.msk.f32.gmra.mrb[2].mxu0 %vm412_vm1, %v424_v51  ;;  %v435_v56 = vsel %vm412_vm1, %v411_v54, 0.0 }
  0xb3   : > { %v434_v57 = vsel %vm412_vm1, %v410_v55, 0.0 }
  0xb4   : > { %v436_v58 = vadd.f32 %v435_v56, %v434_v57 }
  0xb6   : > { %729 = vmatmul.mubr.msk.f32.gmra.mrb[2].mxu1 %vm412_vm1, %v436_v58 }
 0x175   : > { %v721_v60 = vpop.f32.mrb[0].mxu0 }
 0x176   : > { %v545_v61 = vadd.f32 %v721_v60, %v691_v59  ;;  %v539_v62 = vpop.f32.mrb[1].mxu0 }
 0x177   : > { %v540_v63 = vadd.f32 %v691_v59, %v539_v62 }
 0x178   : > { %579 = vst [vmem:[%s242_s8 + $0x8] sm:$0xff] %v545_v61 }
 0x179   : > { %578 = vst [vmem:[%s242_s8] sm:$0xff] %v540_v63  ;;  %v727_v2 = vpop.f32.mrb[0].mxu1 }
 0x17a   : > { %v565_v0 = vadd.f32 %v727_v2, %v691_v59  ;;  %v559_v3 = vpop.f32.mrb[1].mxu1 }
 0x17b   : > { %v560_v4 = vadd.f32 %v691_v59, %v559_v3 }
 0x17c   : > { %583 = vst [vmem:[%s242_s8 + $0x28] sm:$0xff] %v565_v0 }
 0x17d   : > { %582 = vst [vmem:[%s242_s8 + $0x20] sm:$0xff] %v560_v4 }
 0x185   : > { %v724_v5 = vpop.f32.mrb[2].mxu0 }
 0x186   : > { %v555_v6 = vadd.f32 %v724_v5, %v691_v59  ;;  %v549_v1 = vpop.f32.mrb[3].mxu0 }
 0x187   : > { %v550_v7 = vadd.f32 %v691_v59, %v549_v1 }
 0x188   : > { %581 = vst [vmem:[%s242_s8 + $0x18] sm:$0xff] %v555_v6 }
 0x189   : > { %580 = vst [vmem:[%s242_s8 + $0x10] sm:$0xff] %v550_v7  ;;  %v730_v8 = vpop.f32.mrb[2].mxu1 }
 0x18a   : > { %v575_v9 = vadd.f32 %v730_v8, %v691_v59  ;;  %v569_v10 = vpop.f32.mrb[3].mxu1 }
 0x18b   : > { %v570_v11 = vadd.f32 %v691_v59, %v569_v10 }
 0x18c   : > { %585 = vst [vmem:[%s242_s8 + $0x38] sm:$0xff] %v575_v9 }
 0x18d   : > { %584 = vst [vmem:[%s242_s8 + $0x30] sm:$0xff] %v570_v11 }
 0x18e   : > { %804 = shalt.err (!%p801_p5)
}
 0x18f   : > { %s805_s24 = scalar_lea.hbm %s1158_s13, 1024  ;;  %s809_s29 = scalar_lea.hbm %s1215_s5, 2048 }
 0x190   : > { %p806_p6 = scmp.ne.s32.totalorder %s1158_s13, %s805_s24  ;;  %p810_p10 = scmp.lt.u32.totalorder %s1158_s13, %s1215_s5 }
 0x191   : > { %p811_p11 = scmp.lt.u32.totalorder %s809_s29, %s805_s24  ;;  %p813_p13 = scmp.lt.u32.totalorder %s805_s24, %s1158_s13 }
 0x192   : > { %p807_p7 = pnand %p806_p6, %p945_p4 }
 0x193   : > { %p812_p12 = por %p811_p11, %p810_p10 }
 0x194   : > { %p808_p9 = pneg %p807_p7 }
 0x195   : > { %p814_p0 = por %p813_p13, %p812_p12 }
 0x197   : > { %p815_p1 = pnand %p814_p0, %p808_p9 }
 0x199   : > { %818 = shalt.err (!%p815_p1)
}
 0x19a   : > { %s873_s9 = smov 128   ;;  %s874_s11 = smov 8  }
 0x19b   : > { %733 = dma.vmem_to_hbm [thread:$0]  (%p945_p4), %s1160_s10, 1024, %s1158_s13, %s1164_s21, %s873_s9, %s873_s9, %s874_s11  }
 0x19c PF: > { %p739_p2 = scmp.ge.s32.totalorder %s869_s23, 2  ;;  %s617_s12 = sand.u32 1, %s849_s18  }
 0x19d   : > { %s618_s14 = scalar_lea.sflag [#allocation3], %s617_s12 }
 0x19e   : > { %p736_p3 = pnand %p739_p2, %p952_p8 }
 0x1a0   : > { %844 = dma.done.wait (!%p736_p3), %s618_s14, 1024  }
 0x1a1   : > { %846 = vsyncadd (!%p736_p3), %s618_s14, 4294966272  ;;  %s18_s23 = sadd.s32 1, %s869_s23   ;;  %s1218_s18 = smov %s853_s19 }
 0x1a2   : > { %p15_p5 = scmp.ge.s32.totalorder %s18_s23, 4   ;;  %s1219_s19 = smov %s857_s20 }
 0x1a3   : > { %s1220_s20 = smov %s958_s6  ;;  %s1221_s21 = smov %s865_s22 }
 0x1a4   : > { %s1222_s22 = smov %s1224_s26  ;;  %17 = sbr.rel (!%p15_p5) target bundleno = 4 (0x4), region = 75 }
 0x1ab   :  { %623 = vsyncpa [#allocation3], 1 }
 0x1ac   :  { %625 = vsyncpa [#allocation3 + $0x1], 1 }

</bundles_post_ra>
